<compile_context>
chip_gen: v5e
topology: v5e:2x2
jax: 0.10.0
libtpu: 0.0.40
codegen_flags: <defaults>
</compile_context>

<pallas_src>
import functools

import jax
import jax.numpy as jnp
from jax.experimental import pallas as pl
from jax.experimental.pallas import tpu as pltpu


def _static_pow(base, g):
    """base ** g for a compile-time constant g.

    Non-negative integer exponents lower to VPU multiplies (repeated
    squaring); anything else falls back to jnp.power (EUP exp+log).
    """
    gf = float(g)
    if gf == 0.0:
        return jnp.ones_like(base)
    if gf.is_integer() and 0.0 < gf <= 64.0:
        n = int(gf)
        result = None
        cur = base
        while n:
            if n & 1:
                result = cur if result is None else result * cur
            n >>= 1
            if n:
                cur = cur * cur
        return result
    return jnp.power(base, gf)


def _asl_kernel(x_ref, y_ref, out_ref, *, gamma_neg, gamma_pos, clip, eps,
                binary_targets):
    x = x_ref[...].astype(jnp.float32)
    y = y_ref[...].astype(jnp.float32)

    # Sigmoid probabilities.
    xs_pos = jax.nn.sigmoid(x)
    xs_neg = 1.0 - xs_pos

    # Asymmetric clipping (probability shifting) on the negative side.
    if clip is not None and clip > 0:
        xs_neg = jnp.minimum(xs_neg + clip, 1.0)

    if binary_targets:
        # y in {0, 1}: fold the two BCE terms into a single log and replace
        # pow(1-pt, gamma_pos*y + gamma_neg*(1-y)) with a select between two
        # static-integer powers.  Numerically identical to the reference for
        # binarized targets.
        y_mask = y > 0.5
        prob = jnp.where(y_mask, xs_pos, xs_neg)        # == pt of the reference
        loss = jnp.log(jnp.maximum(prob, eps))
        if gamma_neg > 0 or gamma_pos > 0:
            base = 1.0 - prob                           # == 1 - pt
            w_pos = _static_pow(base, gamma_pos)
            w_neg = _static_pow(base, gamma_neg)
            loss = loss * jnp.where(y_mask, w_pos, w_neg)
    else:
        # Exact PyTorch forward (also valid for soft labels).
        los_pos = y * jnp.log(jnp.maximum(xs_pos, eps))
        los_neg = (1.0 - y) * jnp.log(jnp.maximum(xs_neg, eps))
        loss = los_pos + los_neg
        if gamma_neg > 0 or gamma_pos > 0:
            pt = xs_pos * y + xs_neg * (1.0 - y)
            one_sided_gamma = gamma_pos * y + gamma_neg * (1.0 - y)
            loss = loss * jnp.power(1.0 - pt, one_sided_gamma)

    out_ref[...] = (-loss).astype(out_ref.dtype)


def _choose_tiles(B, C, itemsize):
    """Pick (block_rows, block_cols) targeting ~4 MiB per array tile.

    Budget: 3 arrays (x, y, out) x 2 pipeline buffers x tile  ->  ~24 MiB of
    scoped VMEM at f32, which fits comfortably on v5e/v6e (128 MiB) and v7x
    (64 MiB).  block_cols is either the full class dim or a lane-dense
    multiple of 128; block_rows is the full batch or a multiple of 8.
    """
    TARGET_TILE_BYTES = 4 * 1024 * 1024
    MAX_BLOCK_COLS = 2048

    bc = C if C <= MAX_BLOCK_COLS else MAX_BLOCK_COLS

    if B * bc * itemsize <= TARGET_TILE_BYTES:
        br = B                                   # whole batch in one row tile
    else:
        br = TARGET_TILE_BYTES // (bc * itemsize)
        br = max(8, (br // 8) * 8)               # sublane-aligned, guarantees >=2 row blocks
    return int(br), int(bc)


def asymmetric_loss(x, y, *, gamma_neg=4, gamma_pos=1, clip=0.05, eps=1e-8,
                    binary_targets=True, block_rows=None, block_cols=None):
    """Elementwise asymmetric loss, matching AsymmetricLoss.forward (returns -loss)."""
    assert x.shape == y.shape and x.ndim == 2
    B, C = x.shape
    itemsize = max(jnp.dtype(x.dtype).itemsize, jnp.dtype(y.dtype).itemsize)

    auto_br, auto_bc = _choose_tiles(B, C, itemsize)
    br = min(block_rows if block_rows is not None else auto_br, B)
    bc = min(block_cols if block_cols is not None else auto_bc, C)

    # Pad to tile multiples so every block is full; only costs anything for
    # ragged shapes.  Output is sliced back to the original extent.
    Bp = pl.cdiv(B, br) * br
    Cp = pl.cdiv(C, bc) * bc
    if (Bp, Cp) != (B, C):
        x = jnp.pad(x, ((0, Bp - B), (0, Cp - C)))
        y = jnp.pad(y, ((0, Bp - B), (0, Cp - C)))

    grid = (Bp // br, Cp // bc)

    # Explicit scoped-VMEM budget: 2 pipeline buffers each for x, y, out.
    tile_elems = br * bc
    vmem_needed = 2 * tile_elems * (jnp.dtype(x.dtype).itemsize
                                    + jnp.dtype(y.dtype).itemsize
                                    + jnp.dtype(x.dtype).itemsize)
    vmem_limit = int(min(48 * 1024 * 1024,
                         max(32 * 1024 * 1024, int(vmem_needed * 1.5))))

    kernel = functools.partial(
        _asl_kernel,
        gamma_neg=float(gamma_neg),
        gamma_pos=float(gamma_pos),
        clip=clip,
        eps=float(eps),
        binary_targets=binary_targets,
    )

    out = pl.pallas_call(
        kernel,
        out_shape=jax.ShapeDtypeStruct((Bp, Cp), x.dtype),
        grid_spec=pltpu.PrefetchScalarGridSpec(
            num_scalar_prefetch=0,
            grid=grid,
            in_specs=[
                pl.BlockSpec((br, bc), lambda i, j: (i, j)),
                pl.BlockSpec((br, bc), lambda i, j: (i, j)),
            ],
            out_specs=pl.BlockSpec((br, bc), lambda i, j: (i, j)),
        ),
        compiler_params=pltpu.CompilerParams(
            dimension_semantics=("parallel", "parallel"),
            vmem_limit_bytes=vmem_limit,
        ),
    )(x, y)

    if (Bp, Cp) != (B, C):
        out = out[:B, :C]
    return out


def _reference(x, y, gamma_neg=4, gamma_pos=1, clip=0.05, eps=1e-8):
    """Pure-JAX reference mirroring the PyTorch forward exactly."""
    x = x.astype(jnp.float32)
    y = y.astype(jnp.float32)
    xs_pos = jax.nn.sigmoid(x)
    xs_neg = 1.0 - xs_pos
    if clip is not None and clip > 0:
        xs_neg = jnp.minimum(xs_neg + clip, 1.0)
    los_pos = y * jnp.log(jnp.maximum(xs_pos, eps))
    los_neg = (1.0 - y) * jnp.log(jnp.maximum(xs_neg, eps))
    loss = los_pos + los_neg
    pt = xs_pos * y + xs_neg * (1.0 - y)
    gamma = gamma_pos * y + gamma_neg * (1.0 - y)
    loss = loss * jnp.power(1.0 - pt, gamma)
    return -loss


if __name__ == "__main__":
    # AsymmetricLoss has no learnable parameters; hyperparameters only.
    key = jax.random.PRNGKey(0)
    kx, ky = jax.random.split(key)

    B, C = 16, 256  # small multi-label batch: 16 samples x 256 classes
    x = jax.random.normal(kx, (B, C), dtype=jnp.float32) * 2.0       # logits
    y = (jax.random.uniform(ky, (B, C)) < 0.3).astype(jnp.float32)   # binarized targets

    ref = _reference(x, y)

    # 1) Auto-tiled call (whole array fits in one block at this demo size).
    out = jax.block_until_ready(asymmetric_loss(x, y))
    assert out.shape == (B, C) and out.dtype == x.dtype
    assert jnp.allclose(out, ref, atol=1e-4, rtol=1e-4), "mismatch (auto tiles)"

    # 2) Multi-block 2x2 grid, binary fast path.
    out2 = jax.block_until_ready(
        asymmetric_loss(x, y, block_rows=8, block_cols=128))
    assert jnp.allclose(out2, ref, atol=1e-4, rtol=1e-4), "mismatch (2x2 grid)"

    # 3) General soft-label-exact path + ragged batch (exercises padding).
    xr, yr = x[:13], y[:13]
    out3 = jax.block_until_ready(
        asymmetric_loss(xr, yr, binary_targets=False,
                        block_rows=8, block_cols=128))
    assert jnp.allclose(out3, _reference(xr, yr), atol=1e-4, rtol=1e-4), \
        "mismatch (general path / ragged batch)"

    print("KERNEL_OK")
</pallas_src>

<mosaic_0001>
module attributes {stable_mosaic.version = 11 : i64} {
  func.func @_asl_kernel(%arg0: i32, %arg1: i32, %arg2: memref<16x256xf32, #tpu.memory_space<vmem>>, %arg3: memref<16x256xf32, #tpu.memory_space<vmem>>, %arg4: memref<16x256xf32, #tpu.memory_space<vmem>>) attributes {dimension_semantics = [#tpu.dimension_semantics<parallel>, #tpu.dimension_semantics<parallel>], iteration_bounds = array<i64: 1, 1>, scalar_prefetch = 0 : i64, scratch_operands = 0 : i64, tpu.core_type = #tpu.core_type<tc>, window_params = [{transform_indices = @transform_0, window_bounds = array<i64: 16, 256>}, {transform_indices = @transform_1, window_bounds = array<i64: 16, 256>}, {transform_indices = @transform_2, window_bounds = array<i64: 16, 256>}]} {
    %c0 = arith.constant 0 : index
    %c0_0 = arith.constant 0 : index
    %0 = vector.load %arg2[%c0, %c0_0] : memref<16x256xf32, #tpu.memory_space<vmem>>, vector<16x256xf32>
    %c0_1 = arith.constant 0 : index
    %c0_2 = arith.constant 0 : index
    %1 = vector.load %arg3[%c0_1, %c0_2] : memref<16x256xf32, #tpu.memory_space<vmem>>, vector<16x256xf32>
    %2 = arith.negf %0 : vector<16x256xf32>
    %3 = math.exp %2 : vector<16x256xf32>
    %cst = arith.constant 1.000000e+00 : f32
    %4 = vector.broadcast %cst : f32 to vector<16x256xf32>
    %5 = arith.addf %4, %3 : vector<16x256xf32>
    %6 = arith.divf %4, %5 : vector<16x256xf32>
    %cst_3 = arith.constant 1.000000e+00 : f32
    %7 = vector.broadcast %cst_3 : f32 to vector<16x256xf32>
    %8 = arith.subf %7, %6 : vector<16x256xf32>
    %cst_4 = arith.constant 5.000000e-02 : f32
    %9 = vector.broadcast %cst_4 : f32 to vector<16x256xf32>
    %10 = arith.addf %8, %9 : vector<16x256xf32>
    %cst_5 = arith.constant 1.000000e+00 : f32
    %11 = vector.broadcast %cst_5 : f32 to vector<16x256xf32>
    %12 = arith.minimumf %10, %11 : vector<16x256xf32>
    %cst_6 = arith.constant 5.000000e-01 : f32
    %13 = vector.broadcast %cst_6 : f32 to vector<16x256xf32>
    %14 = arith.cmpf ogt, %1, %13 : vector<16x256xf32>
    %15 = arith.select %14, %6, %12 : vector<16x256xi1>, vector<16x256xf32>
    %cst_7 = arith.constant 9.99999993E-9 : f32
    %16 = vector.broadcast %cst_7 : f32 to vector<16x256xf32>
    %17 = arith.maximumf %15, %16 : vector<16x256xf32>
    %18 = math.log %17 : vector<16x256xf32>
    %cst_8 = arith.constant 1.000000e+00 : f32
    %19 = vector.broadcast %cst_8 : f32 to vector<16x256xf32>
    %20 = arith.subf %19, %15 : vector<16x256xf32>
    %21 = arith.mulf %20, %20 : vector<16x256xf32>
    %22 = arith.mulf %21, %21 : vector<16x256xf32>
    %23 = arith.select %14, %20, %22 : vector<16x256xi1>, vector<16x256xf32>
    %24 = arith.mulf %18, %23 : vector<16x256xf32>
    %cst_9 = arith.constant 0.000000e+00 : f32
    %25 = vector.broadcast %cst_9 : f32 to vector<16x256xf32>
    %26 = arith.subf %25, %24 : vector<16x256xf32>
    %c0_10 = arith.constant 0 : index
    %c0_11 = arith.constant 0 : index
    %27 = vector.load %arg4[%c0_10, %c0_11] : memref<16x256xf32, #tpu.memory_space<vmem>>, vector<16x256xf32>
    tpu.vector_store %arg4[%c0_10, %c0_11], %26 {strides = array<i32>} : memref<16x256xf32, #tpu.memory_space<vmem>>, vector<16x256xf32>,
    return
  }
  func.func @transform_0(%arg0: i32, %arg1: i32) -> (i32, i32) {
    %c0_i32 = arith.constant 0 : i32
    return %arg0, %arg1 : i32, i32
  }
  func.func @transform_1(%arg0: i32, %arg1: i32) -> (i32, i32) {
    %c0_i32 = arith.constant 0 : i32
    return %arg0, %arg1 : i32, i32
  }
  func.func @transform_2(%arg0: i32, %arg1: i32) -> (i32, i32) {
    %c0_i32 = arith.constant 0 : i32
    return %arg0, %arg1 : i32, i32
  }
}

</mosaic_0001>

<bundles_post_ra>
// kernel: tpu_custom_call.1
= control target key start
LH: loop header
LB: loop body
LE: loop exit
PB: predicated region body
PF: predicated region fallthrough
CT: control target
= control target key end

     0   :  { %7 = vsyncpa [#allocation3], 0  ;;  %s411_s0 = inlined_call_operand.hbm [shape: f32[16,256], index: 0, kind: input, shape index: {}]   ;;  %s412_s1 = inlined_call_operand.hbm [shape: f32[16,256], index: 1, kind: input, shape index: {}]   ;;  %s413_s2 = inlined_call_operand.hbm [shape: f32[16,256], index: 2, kind: output, shape index: {}]  }
   0x1   :  { %8 = vsyncpa [#allocation6], 0 }
   0x2   :  { %9 = vsyncpa [#allocation4], 0  ;;  %s14_s11 = sshll.u32 %s411_s0, 4  ;;  %s319_s12 = smov [#allocation2]   ;;  %s15_s11 = int_to_ptr.hbm [resolvable:$true] %s14_s11 }
   0x3   :  { %s16_s13 = sshll.u32 %s319_s12, 4  ;;  %s27_s16 = sshll.u32 %s412_s1, 4  ;;  %s17_s13 = int_to_ptr.vmem [resolvable:$true] %s16_s13  ;;  %s28_s16 = int_to_ptr.hbm [resolvable:$true] %s27_s16 }
   0x4   :  { %s320_s17 = smov 256   ;;  %s321_s18 = smov 16  }
   0x5   :  { %22 = dma.hbm_to_vmem [thread:$0]  %s15_s11, 512, %s17_s13, [#allocation3], %s320_s17, %s320_s17, %s321_s18  }
   0x6   :  { %s322_s19 = smov [#allocation5]  }
   0x7   :  { %s29_s20 = sshll.u32 %s322_s19, 4  ;;  %s30_s20 = int_to_ptr.vmem [resolvable:$true] %s29_s20 }
   0x8   :  { %35 = dma.hbm_to_vmem [thread:$0]  %s28_s16, 512, %s30_s20, [#allocation6], %s320_s17, %s320_s17, %s321_s18  }
   0x9   :  { %313 = dma.done.wait [#allocation3], 512  }
   0xa   :  { %314 = vsyncadd [#allocation3], 4294966784 }
   0xb   :  { %315 = dma.done.wait [#allocation6], 512  }
   0xc   :  { %316 = vsyncadd [#allocation6], 4294966784  ;;  %v44_v0 = vld [vmem:[#allocation2] sm:$0xff]  ;;  %v45_v1 = vld [vmem:[#allocation2 + $0x8] sm:$0xff]  ;;  %s323_s0 = smov [#allocation7]   ;;  %s194_s23 = sshll.u32 %s413_s2, 4  ;;  %s195_s23 = int_to_ptr.hbm [resolvable:$true] %s194_s23 }
   0xd   :  { %v208_v2 = vmul.f32 -1.442695, %v44_v0  ;;  %v209_v3 = vmul.f32 -1.442695, %v45_v1  ;;  %v46_v4 = vld [vmem:[#allocation2 + $0x10] sm:$0xff]  ;;  %v47_v5 = vld [vmem:[#allocation2 + $0x18] sm:$0xff] }
   0xe   :  { %v210_v6 = vmul.f32 -1.442695, %v46_v4  ;;  %v211_v7 = vmul.f32 -1.442695, %v47_v5  ;;  %v48_v54 = vld [vmem:[#allocation5] sm:$0xff]  ;;  %v49_v60 = vld [vmem:[#allocation5 + $0x8] sm:$0xff] }
   0xf   :  { %217 = vpow2.f32 %v208_v2  ;;  %v50_v2 = vld [vmem:[#allocation5 + $0x10] sm:$0xff]  ;;  %s192_s1 = sshll.u32 %s323_s0, 4  ;;  %s193_s1 = int_to_ptr.vmem [resolvable:$true] %s192_s1 }
  0x10   :  { %219 = vpow2.f32 %v209_v3 }
  0x11   :  { %221 = vpow2.f32 %v210_v6 }
  0x12   :  { %223 = vpow2.f32 %v211_v7 }
  0x15   :  { %v218_v8 = vpop.eup %217 }
  0x16   :  { %v220_v9 = vpop.eup %219  ;;  %v64_v10 = vadd.f32 1.0, %v218_v8 }
  0x17   :  { %v222_v11 = vpop.eup %221  ;;  %v65_v12 = vadd.f32 1.0, %v220_v9  ;;  %v51_v9 = vld [vmem:[#allocation5 + $0x18] sm:$0xff] }
  0x18   :  { %v224_v13 = vpop.eup %223  ;;  %225 = vrcp.f32 %v64_v10  ;;  %v66_v14 = vadd.f32 1.0, %v222_v11  ;;  %v77_v16 = vand.u32 2147483647, %v64_v10  ;;  %v79_v17 = vand.u32 2147483648, %v64_v10 }
  0x19   :  { %227 = vrcp.f32 %v65_v12  ;;  %v67_v15 = vadd.f32 1.0, %v224_v13  ;;  %v92_v19 = vand.u32 2147483647, %v65_v12  ;;  %v94_v20 = vand.u32 2147483648, %v65_v12 }
  0x1a   :  { %229 = vrcp.f32 %v66_v14  ;;  %vm73_vm0 = vweird.f32 %v64_v10  ;;  %vm88_vm1 = vweird.f32 %v65_v12  ;;  %vm351_vm3 = vcmp.eq.f32.partialorder %v77_v16, 8.507059e+37 }
  0x1b   :  { %231 = vrcp.f32 %v67_v15  ;;  %v80_v26 = vor.u32 1.1754944e-38, %v79_v17  ;;  %vm355_vm5 = vcmp.eq.f32.partialorder %v92_v19, 8.507059e+37  ;;  %v95_v30 = vor.u32 1.1754944e-38, %v94_v20 }
  0x1c   :  { %vm103_vm6 = vweird.f32 %v66_v14  ;;  %v107_v34 = vand.u32 2147483647, %v66_v14  ;;  %v109_v37 = vand.u32 2147483648, %v66_v14  ;;  %vm118_vm8 = vweird.f32 %v67_v15 }
  0x1d   :  { %v124_v42 = vand.u32 2147483648, %v67_v15  ;;  %v122_v45 = vand.u32 2147483647, %v67_v15 }
  0x1e   :  { %v226_v18 = vpop.eup %225  ;;  %vm371_vm12 = vcmp.eq.f32.partialorder %v107_v34, 8.507059e+37  ;;  %v110_v52 = vor.u32 1.1754944e-38, %v109_v37 }
  0x1f   :  { %v228_v21 = vpop.eup %227  ;;  %v69_v22 = vmul.f32 %v226_v18, %v64_v10  ;;  %vm74_vm2 = vweird.f32 %v226_v18  ;;  %v125_v59 = vor.u32 1.1754944e-38, %v124_v42  ;;  %vm123_vm15 = vcmp.eq.f32.partialorder %v122_v45, 8.507059e+37 }
  0x20   :  { %v84_v23 = vmul.f32 %v228_v21, %v65_v12  ;;  %v230_v27 = vpop.eup %229  ;;  %vm89_vm4 = vweird.f32 %v228_v21  ;;  %vm360_vm7 = vmor %vm73_vm0, %vm74_vm2  ;;  %vm140_vm0 = vcmp.gt.f32.partialorder %v48_v54, 0.5  ;;  %vm142_vm2 = vcmp.gt.f32.partialorder %v50_v2, 0.5 }
  0x21   :  { %v70_v24 = vsub.f32 1.0, %v69_v22  ;;  %v232_v31 = vpop.eup %231  ;;  %v99_v33 = vmul.f32 %v230_v27, %v66_v14  ;;  %vm365_vm9 = vmor %vm88_vm1, %vm89_vm4  ;;  %vm104_vm10 = vweird.f32 %v230_v27  ;;  %vm141_vm1 = vcmp.gt.f32.partialorder %v49_v60, 0.5 }
  0x22   :  { %v85_v28 = vsub.f32 1.0, %v84_v23  ;;  %v114_v38 = vmul.f32 %v232_v31, %v67_v15  ;;  %vm119_vm11 = vweird.f32 %v232_v31  ;;  %vm380_vm13 = vmor %vm103_vm6, %vm104_vm10 }
  0x23   :  { %v71_v32 = vmul.f32 %v226_v18, %v70_v24  ;;  %v100_v41 = vsub.f32 1.0, %v99_v33  ;;  %vm387_vm14 = vmor %vm118_vm8, %vm119_vm11 }
  0x24   :  { %v86_v36 = vmul.f32 %v228_v21, %v85_v28  ;;  %v115_v44 = vsub.f32 1.0, %v114_v38 }
  0x25   :  { %v72_v39 = vadd.f32 %v226_v18, %v71_v32  ;;  %v101_v47 = vmul.f32 %v230_v27, %v100_v41 }
  0x26   :  { %v87_v43 = vadd.f32 %v228_v21, %v86_v36  ;;  %v116_v53 = vmul.f32 %v232_v31, %v115_v44 }
  0x27   :  { %v76_v46 = vsel %vm360_vm7, %v226_v18, %v72_v39  ;;  %v102_v57 = vadd.f32 %v230_v27, %v101_v47 }
  0x28   :  { %v81_v49 = vsel %vm351_vm3, %v80_v26, %v76_v46  ;;  %v91_v50 = vsel %vm365_vm9, %v228_v21, %v87_v43  ;;  %v117_v62 = vadd.f32 %v232_v31, %v116_v53  ;;  %vm143_vm3 = vcmp.gt.f32.partialorder %v51_v9, 0.5 }
  0x29   :  { %v128_v55 = vsub.f32 1.0, %v81_v49  ;;  %v96_v56 = vsel %vm355_vm5, %v95_v30, %v91_v50  ;;  %v106_v0 = vsel %vm380_vm13, %v230_v27, %v102_v57 }
  0x2a   :  { %v129_v61 = vsub.f32 1.0, %v96_v56  ;;  %v111_v3 = vsel %vm371_vm12, %v110_v52, %v106_v0  ;;  %v121_v4 = vsel %vm387_vm14, %v232_v31, %v117_v62 }
  0x2b   :  { %v132_v63 = vadd.f32 0.05, %v128_v55  ;;  %v130_v6 = vsub.f32 1.0, %v111_v3  ;;  %v126_v7 = vsel %vm123_vm15, %v125_v59, %v121_v4 }
  0x2c   :  { %v133_v1 = vadd.f32 0.05, %v129_v61  ;;  %v131_v10 = vsub.f32 1.0, %v126_v7 }
  0x2d   :  { %v136_v5 = vmin.f32 %v132_v63, 1.0  ;;  %v134_v12 = vadd.f32 0.05, %v130_v6 }
  0x2e   :  { %v137_v8 = vmin.f32 %v133_v1, 1.0  ;;  %v135_v16 = vadd.f32 0.05, %v131_v10 }
  0x2f   :  { %v144_v11 = vsel %vm140_vm0, %v81_v49, %v136_v5  ;;  %v138_v19 = vmin.f32 %v134_v12, 1.0 }
  0x30   :  { %v148_v13 = vmax.f32 %v144_v11, 1e-08  ;;  %v160_v14 = vsub.f32 1.0, %v144_v11  ;;  %v145_v15 = vsel %vm141_vm1, %v96_v56, %v137_v8  ;;  %v139_v21 = vmin.f32 %v135_v16, 1.0 }
  0x31   :  { %v149_v17 = vmax.f32 %v145_v15, 1e-08  ;;  %v161_v18 = vsub.f32 1.0, %v145_v15  ;;  %v146_v23 = vsel %vm142_vm2, %v111_v3, %v138_v19 }
  0x32   :  { %233 = vlog2.f32 %v148_v13  ;;  %v164_v20 = vmul.f32 %v160_v14, %v160_v14  ;;  %v150_v25 = vmax.f32 %v146_v23, 1e-08  ;;  %v162_v26 = vsub.f32 1.0, %v146_v23 }
  0x33   :  { %235 = vlog2.f32 %v149_v17  ;;  %v165_v22 = vmul.f32 %v161_v18, %v161_v18  ;;  %v147_v27 = vsel %vm143_vm3, %v126_v7, %v139_v21 }
  0x34   :  { %v168_v24 = vmul.f32 %v164_v20, %v164_v20  ;;  %v151_v29 = vmax.f32 %v147_v27, 1e-08  ;;  %v163_v30 = vsub.f32 1.0, %v147_v27  ;;  %237 = vlog2.f32 %v150_v25 }
  0x35   :  { %v169_v28 = vmul.f32 %v165_v22, %v165_v22  ;;  %v166_v31 = vmul.f32 %v162_v26, %v162_v26 }
  0x36   :  { %239 = vlog2.f32 %v151_v29  ;;  %v167_v32 = vmul.f32 %v163_v30, %v163_v30  ;;  %v172_v34 = vsel %vm140_vm0, %v160_v14, %v168_v24 }
  0x37   :  { %v170_v35 = vmul.f32 %v166_v31, %v166_v31  ;;  %v173_v38 = vsel %vm141_vm1, %v161_v18, %v169_v28 }
  0x38   :  { %v234_v33 = vpop.eup %233  ;;  %v171_v39 = vmul.f32 %v167_v32, %v167_v32 }
  0x39   :  { %v236_v36 = vpop.eup %235  ;;  %v153_v37 = vmul.f32 0.6931472, %v234_v33  ;;  %v174_v44 = vsel %vm142_vm2, %v162_v26, %v170_v35 }
  0x3a   :  { %v155_v40 = vmul.f32 0.6931472, %v236_v36  ;;  %v238_v42 = vpop.eup %237  ;;  %v175_v48 = vsel %vm143_vm3, %v163_v30, %v171_v39 }
  0x3b   :  { %v176_v41 = vmul.f32 %v172_v34, %v153_v37  ;;  %v157_v47 = vmul.f32 0.6931472, %v238_v42 }
  0x3c   :  { %v177_v43 = vmul.f32 %v173_v38, %v155_v40  ;;  %v240_v45 = vpop.eup %239 }
  0x3d   :  { %v180_v46 = vsub.f32 0.0, %v176_v41  ;;  %v159_v50 = vmul.f32 0.6931472, %v240_v45  ;;  %v178_v51 = vmul.f32 %v174_v44, %v157_v47 }
  0x3e   :  { %v181_v49 = vsub.f32 0.0, %v177_v43 }
  0x3f   :  { %184 = vst [vmem:[#allocation7] sm:$0xff] %v180_v46  ;;  %v179_v52 = vmul.f32 %v175_v48, %v159_v50  ;;  %v182_v53 = vsub.f32 0.0, %v178_v51 }
  0x40   :  { %185 = vst [vmem:[#allocation7 + $0x8] sm:$0xff] %v181_v49 }
  0x41   :  { %v183_v54 = vsub.f32 0.0, %v179_v52  ;;  %186 = vst [vmem:[#allocation7 + $0x10] sm:$0xff] %v182_v53 }
  0x43   :  { %187 = vst [vmem:[#allocation7 + $0x18] sm:$0xff] %v183_v54 }
  0x44   :  { %200 = dma.vmem_to_hbm [thread:$0]  %s193_s1, 512, %s195_s23, [#allocation4], %s320_s17, %s320_s17, %s321_s18  }
  0x45   :  { %317 = dma.done.wait [#allocation4], 512  }
  0x46   :  { %318 = vsyncadd [#allocation4], 4294966784 }
  0x47   :  { %205 = vsyncpa [#allocation3], 1 }
  0x48   :  { %206 = vsyncpa [#allocation6], 1 }
  0x49   :  { %207 = vsyncpa [#allocation4], 1 }

</bundles_post_ra>
